<compile_context>
chip_gen: v7x
topology: tpu7x:2x2x1
jax: 0.10.0
libtpu: 0.0.40
codegen_flags: <defaults>
</compile_context>

<pallas_src>
import functools

import jax
import jax.numpy as jnp
from jax.experimental import pallas as pl
from jax.experimental.pallas import tpu as pltpu


def _round_up(a, b):
    return -(-a // b) * b


def _vmem_capacity_bytes():
    try:
        return int(pltpu.get_tpu_info().vmem_capacity_bytes)
    except Exception:
        return 64 * 1024 * 1024   # conservative fallback: v7x per-TensorCore VMEM


def _supports_bf16_math():
    # bf16 VALU/EUP exists on v6e / v7x; keep f32 elementwise math elsewhere (v5e etc).
    try:
        kind = jax.devices()[0].device_kind.lower()
    except Exception:
        return False
    return ("v6" in kind) or ("v7" in kind)


def _soft_ce_kernel(x_ref, t_ref, o_ref,
                    m_x_ref, s_x_ref, m_t_ref, s_t_ref, d_ref, *,
                    block_rows, block_classes, total_rows, total_classes,
                    mask_rows, mask_classes, compute_dtype):
    """Streaming (online-LSE) soft-label CE over a (row-tile, class-chunk) grid."""
    i = pl.program_id(0)
    k = pl.program_id(1)
    num_k = pl.num_programs(1)
    f32 = jnp.float32
    cd = compute_dtype

    @pl.when(k == 0)
    def _init():
        m_x_ref[...] = jnp.full_like(m_x_ref, -jnp.inf)
        m_t_ref[...] = jnp.full_like(m_t_ref, -jnp.inf)
        s_x_ref[...] = jnp.zeros_like(s_x_ref)
        s_t_ref[...] = jnp.zeros_like(s_t_ref)
        d_ref[...] = jnp.zeros_like(d_ref)

    x = x_ref[...]                      # (tb, bc) in HBM dtype
    t = t_ref[...]

    if mask_classes:
        # Class-tail mask: finite large-negative so exp() -> 0 and 0*masked == 0.
        col = k * block_classes + jax.lax.broadcasted_iota(
            jnp.int32, (1, block_classes), 1)
        col_ok = col < total_classes
        x = jnp.where(col_ok, x, jnp.asarray(-1e30, dtype=x.dtype))
        t = jnp.where(col_ok, t, jnp.asarray(-1e30, dtype=t.dtype))

    xc = x.astype(cd)
    tc = t.astype(cd)

    # ---- input logits: online log-sum-exp --------------------------------
    m_x_old = m_x_ref[...]
    m_x_new = jnp.maximum(m_x_old,
                          jnp.max(x, axis=-1, keepdims=True).astype(f32))
    p = jnp.exp(xc - m_x_new.astype(cd))
    s_x_chunk = jnp.sum(p, axis=-1, keepdims=True, dtype=f32)

    # ---- target logits: online softmax weights + weighted dot ------------
    m_t_old = m_t_ref[...]
    m_t_new = jnp.maximum(m_t_old,
                          jnp.max(t, axis=-1, keepdims=True).astype(f32))
    w = jnp.exp(tc - m_t_new.astype(cd))
    s_t_chunk = jnp.sum(w, axis=-1, keepdims=True, dtype=f32)
    # TODO(synk): in the v7x bf16 regime these lane reductions could be offloaded
    # to the idle MXU via a (bc, 128) ones matmul to unload the VALU/XLU slots.
    d_chunk = jnp.sum(w * xc, axis=-1, keepdims=True, dtype=f32)

    alpha_x = jnp.exp(m_x_old - m_x_new)        # exactly 0.0 on the first chunk
    alpha_t = jnp.exp(m_t_old - m_t_new)
    s_x_ref[...] = alpha_x * s_x_ref[...] + s_x_chunk
    s_t_ref[...] = alpha_t * s_t_ref[...] + s_t_chunk
    d_ref[...] = alpha_t * d_ref[...] + d_chunk
    m_x_ref[...] = m_x_new
    m_t_ref[...] = m_t_new

    @pl.when(k == num_k - 1)
    def _finalize():
        lse = m_x_ref[...] + jnp.log(s_x_ref[...])          # (tb, 1)
        per_row = lse - d_ref[...] / s_t_ref[...]           # (tb, 1)
        if mask_rows:
            row = i * block_rows + jax.lax.broadcasted_iota(
                jnp.int32, (block_rows, 1), 0)
            per_row = jnp.where(row < total_rows, per_row, 0.0)
        # Lane-dense partial-sum block for this row tile (reduced outside).
        o_ref[...] = jnp.full(o_ref.shape, jnp.sum(per_row), dtype=jnp.float32)


def soft_label_ce_with_logits_loss(inp, target, *,
                                   max_block_rows=2048,
                                   max_block_classes=None,
                                   compute_dtype=None):
    """Pallas equivalent of SoftLabelCEWithLogitsLoss(dim=-1).forward(input, target)."""
    assert inp.shape == target.shape, "input/target must have identical shapes"
    num_classes = inp.shape[-1]
    x2 = inp.reshape(-1, num_classes)        # flatten leading dims into rows
    t2 = target.reshape(-1, num_classes)
    n_rows = x2.shape[0]

    in_isz = jnp.dtype(x2.dtype).itemsize
    tgt_isz = jnp.dtype(t2.dtype).itemsize

    if compute_dtype is None:
        both_bf16 = (x2.dtype == jnp.bfloat16) and (t2.dtype == jnp.bfloat16)
        compute_dtype = jnp.bfloat16 if (both_bf16 and _supports_bf16_math()) \
            else jnp.float32
    c_isz = jnp.dtype(compute_dtype).itemsize

    # Native sublane multiple of the narrowest streamed dtype (8/16/32).
    sub = 8 * (4 // min(in_isz, tgt_isz, 4))

    # ---- VMEM sizing: inputs (double-buffered) + live compute-dtype temps ----
    vmem_cap = _vmem_capacity_bytes()                           # 64 MiB v7x, 128 MiB v5e/v6e
    vmem_limit = int(min(vmem_cap * 5 // 8, 96 * 1024 * 1024))  # ~40 MiB / ~80 MiB
    budget = vmem_limit * 3 // 5                                # working-set target w/ headroom

    # bytes per (row, lane-padded class) slot:
    #   2 pipeline buffers per input + ~4 live (tb, bc) compute-dtype temporaries
    per_slot = 2 * (in_isz + tgt_isz) + 4 * c_isz
    scratch_per_row = 5 * 128 * 4           # five (tb,1) f32 accumulators, lane padded

    def tb_for(bc):
        bpr = per_slot * _round_up(bc, 128) + scratch_per_row
        return (budget // bpr) // sub * sub

    row_target = min(_round_up(n_rows, sub), max(128, sub))

    # ---- class-chunk size -------------------------------------------------
    if max_block_classes is not None:
        bc = min(num_classes, max(1, int(max_block_classes)))
    elif tb_for(num_classes) >= row_target:
        bc = num_classes                    # whole class dim in one chunk
    else:
        # Stream over classes (online LSE) so vocab-sized C fits in VMEM while
        # keeping a decent row tile.
        bc = (budget - row_target * scratch_per_row) // (per_slot * row_target)
        bc = min(num_classes, bc)
    if bc < num_classes:
        bc = max(128, (bc // 128) * 128)    # partial class blocks must be lane-aligned
    bc = min(bc, num_classes)

    # ---- row-tile size ------------------------------------------------------
    tb = min(max(sub, tb_for(bc)), max_block_rows)
    # Keep >= ~4 row tiles when possible: the "parallel" row axis only helps the
    # v7x 2-TensorCore megacore (and DMA/compute overlap) with >1 grid step.
    tb = min(tb, _round_up(pl.cdiv(n_rows, 4), sub))
    tb = min(tb, _round_up(n_rows, sub))
    tb = max(sub, (tb // sub) * sub)

    num_row_tiles = pl.cdiv(n_rows, tb)
    num_class_tiles = pl.cdiv(num_classes, bc)
    grid = (num_row_tiles, num_class_tiles)

    kernel = functools.partial(
        _soft_ce_kernel,
        block_rows=tb, block_classes=bc,
        total_rows=n_rows, total_classes=num_classes,
        mask_rows=(n_rows % tb != 0),
        mask_classes=(num_classes % bc != 0),
        compute_dtype=compute_dtype)

    partials = pl.pallas_call(
        kernel,
        out_shape=jax.ShapeDtypeStruct((num_row_tiles, 8, 128), jnp.float32),
        grid_spec=pltpu.PrefetchScalarGridSpec(
            num_scalar_prefetch=0,
            grid=grid,
            in_specs=[
                pl.BlockSpec((tb, bc), lambda i, k: (i, k)),
                pl.BlockSpec((tb, bc), lambda i, k: (i, k)),
            ],
            out_specs=pl.BlockSpec((1, 8, 128), lambda i, k: (i, 0, 0)),
            scratch_shapes=[pltpu.VMEM((tb, 1), jnp.float32)] * 5,
        ),
        compiler_params=pltpu.CompilerParams(
            dimension_semantics=("parallel", "arbitrary"),
            vmem_limit_bytes=vmem_limit,
        ),
        cost_estimate=pl.CostEstimate(
            flops=10 * n_rows * num_classes,
            transcendentals=2 * n_rows * num_classes,
            bytes_accessed=(x2.size * in_isz + t2.size * tgt_isz
                            + num_row_tiles * 8 * 128 * 4),
        ),
    )(x2, t2)

    # Tiny final reduction + mean outside the kernel.
    return jnp.sum(partials[:, 0, 0]) / jnp.float32(n_rows)


def _reference(inp, target):
    t_sm = jax.nn.softmax(target, axis=-1)
    log_sm = jax.nn.log_softmax(inp, axis=-1)
    return jnp.mean(jnp.sum(-t_sm * log_sm, axis=-1))


if __name__ == "__main__":
    key = jax.random.PRNGKey(0)
    k1, k2, k3, k4, k5, k6 = jax.random.split(key, 6)

    # 1) student-MLP style logits: [batch, classes], f32, single class chunk.
    batch, num_classes = 16, 32
    student_logits = jax.random.normal(k1, (batch, num_classes), dtype=jnp.float32)
    teacher_logits = jax.random.normal(k2, (batch, num_classes), dtype=jnp.float32)
    loss = jax.block_until_ready(
        soft_label_ce_with_logits_loss(student_logits, teacher_logits))
    ref = _reference(student_logits, teacher_logits)
    assert jnp.allclose(loss, ref, atol=2e-5, rtol=2e-5), (loss, ref)

    # 2) exercise the streaming class path (online LSE) + row/class tail masks.
    xs = jax.random.normal(k3, (50, 640), dtype=jnp.float32)
    ts = jax.random.normal(k4, (50, 640), dtype=jnp.float32)
    loss2 = jax.block_until_ready(
        soft_label_ce_with_logits_loss(xs, ts, max_block_classes=256))
    ref2 = _reference(xs, ts)
    assert jnp.allclose(loss2, ref2, atol=1e-4, rtol=1e-4), (loss2, ref2)

    # 3) bf16 inputs (bf16 elementwise math on v6e/v7x, f32 elsewhere).
    xb = jax.random.normal(k5, (64, 384), dtype=jnp.float32).astype(jnp.bfloat16)
    tb = jax.random.normal(k6, (64, 384), dtype=jnp.float32).astype(jnp.bfloat16)
    loss3 = jax.block_until_ready(soft_label_ce_with_logits_loss(xb, tb))
    ref3 = _reference(xb.astype(jnp.float32), tb.astype(jnp.float32))
    assert jnp.allclose(loss3, ref3, atol=5e-2, rtol=5e-2), (loss3, ref3)

    print("KERNEL_OK")
</pallas_src>

<mosaic_0001>
module attributes {stable_mosaic.version = 11 : i64} {
  func.func @_soft_ce_kernel(%arg0: i32, %arg1: i32, %arg2: memref<8x32xf32, #tpu.memory_space<vmem>>, %arg3: memref<8x32xf32, #tpu.memory_space<vmem>>, %arg4: memref<1x8x128xf32, #tpu.memory_space<vmem>>, %arg5: memref<8x1xf32, #tpu.memory_space<vmem>>, %arg6: memref<8x1xf32, #tpu.memory_space<vmem>>, %arg7: memref<8x1xf32, #tpu.memory_space<vmem>>, %arg8: memref<8x1xf32, #tpu.memory_space<vmem>>, %arg9: memref<8x1xf32, #tpu.memory_space<vmem>>) attributes {dimension_semantics = [#tpu.dimension_semantics<parallel>, #tpu.dimension_semantics<arbitrary>], iteration_bounds = array<i64: 2, 1>, scalar_prefetch = 0 : i64, scratch_operands = 5 : i64, tpu.core_type = #tpu.core_type<tc>, window_params = [{transform_indices = @transform_0, window_bounds = array<i64: 8, 32>}, {transform_indices = @transform_1, window_bounds = array<i64: 8, 32>}, {transform_indices = @transform_2, window_bounds = array<i64: 1, 8, 128>}]} {
    %c0_i32 = arith.constant 0 : i32
    %0 = arith.cmpi eq, %arg1, %c0_i32 : i32
    %1 = arith.extui %0 : i1 to i32
    %c0_i32_0 = arith.constant 0 : i32
    %2 = arith.cmpi ne, %1, %c0_i32_0 : i32
    scf.if %2 {
      %cst_30 = arith.constant 0xFF800000 : f32
      %47 = vector.broadcast %cst_30 : f32 to vector<8x1xf32>
      %c0_31 = arith.constant 0 : index
      %c0_32 = arith.constant 0 : index
      %48 = vector.load %arg5[%c0_31, %c0_32] : memref<8x1xf32, #tpu.memory_space<vmem>>, vector<8x1xf32>
      tpu.vector_store %arg5[%c0_31, %c0_32], %47 {strides = array<i32>} : memref<8x1xf32, #tpu.memory_space<vmem>>, vector<8x1xf32>,
      %cst_33 = arith.constant 0xFF800000 : f32
      %49 = vector.broadcast %cst_33 : f32 to vector<8x1xf32>
      %c0_34 = arith.constant 0 : index
      %c0_35 = arith.constant 0 : index
      %50 = vector.load %arg7[%c0_34, %c0_35] : memref<8x1xf32, #tpu.memory_space<vmem>>, vector<8x1xf32>
      tpu.vector_store %arg7[%c0_34, %c0_35], %49 {strides = array<i32>} : memref<8x1xf32, #tpu.memory_space<vmem>>, vector<8x1xf32>,
      %cst_36 = arith.constant 0.000000e+00 : f32
      %51 = vector.broadcast %cst_36 : f32 to vector<8x1xf32>
      %c0_37 = arith.constant 0 : index
      %c0_38 = arith.constant 0 : index
      %52 = vector.load %arg6[%c0_37, %c0_38] : memref<8x1xf32, #tpu.memory_space<vmem>>, vector<8x1xf32>
      tpu.vector_store %arg6[%c0_37, %c0_38], %51 {strides = array<i32>} : memref<8x1xf32, #tpu.memory_space<vmem>>, vector<8x1xf32>,
      %cst_39 = arith.constant 0.000000e+00 : f32
      %53 = vector.broadcast %cst_39 : f32 to vector<8x1xf32>
      %c0_40 = arith.constant 0 : index
      %c0_41 = arith.constant 0 : index
      %54 = vector.load %arg8[%c0_40, %c0_41] : memref<8x1xf32, #tpu.memory_space<vmem>>, vector<8x1xf32>
      tpu.vector_store %arg8[%c0_40, %c0_41], %53 {strides = array<i32>} : memref<8x1xf32, #tpu.memory_space<vmem>>, vector<8x1xf32>,
      %cst_42 = arith.constant 0.000000e+00 : f32
      %55 = vector.broadcast %cst_42 : f32 to vector<8x1xf32>
      %c0_43 = arith.constant 0 : index
      %c0_44 = arith.constant 0 : index
      %56 = vector.load %arg9[%c0_43, %c0_44] : memref<8x1xf32, #tpu.memory_space<vmem>>, vector<8x1xf32>
      tpu.vector_store %arg9[%c0_43, %c0_44], %55 {strides = array<i32>} : memref<8x1xf32, #tpu.memory_space<vmem>>, vector<8x1xf32>,
    } else {
    }
    %c0 = arith.constant 0 : index
    %c0_1 = arith.constant 0 : index
    %3 = vector.load %arg2[%c0, %c0_1] : memref<8x32xf32, #tpu.memory_space<vmem>>, vector<8x32xf32>
    %c0_2 = arith.constant 0 : index
    %c0_3 = arith.constant 0 : index
    %4 = vector.load %arg3[%c0_2, %c0_3] : memref<8x32xf32, #tpu.memory_space<vmem>>, vector<8x32xf32>
    %c0_4 = arith.constant 0 : index
    %c0_5 = arith.constant 0 : index
    %5 = vector.load %arg5[%c0_4, %c0_5] : memref<8x1xf32, #tpu.memory_space<vmem>>, vector<8x1xf32>
    %cst = arith.constant dense<0xFF800000> : vector<8xf32>
    %6 = vector.multi_reduction <maximumf>, %3, %cst [1] : vector<8x32xf32> to vector<8xf32>
    %7 = vector.shape_cast %6 : vector<8xf32> to vector<8x1xf32>
    %8 = arith.maximumf %5, %7 : vector<8x1xf32>
    %9 = vector.broadcast %8 : vector<8x1xf32> to vector<8x32xf32>
    %10 = arith.subf %3, %9 : vector<8x32xf32>
    %11 = math.exp %10 : vector<8x32xf32>
    %cst_6 = arith.constant dense<0.000000e+00> : vector<8xf32>
    %12 = vector.multi_reduction <add>, %11, %cst_6 [1] : vector<8x32xf32> to vector<8xf32>
    %13 = vector.shape_cast %12 : vector<8xf32> to vector<8x1xf32>
    %c0_7 = arith.constant 0 : index
    %c0_8 = arith.constant 0 : index
    %14 = vector.load %arg7[%c0_7, %c0_8] : memref<8x1xf32, #tpu.memory_space<vmem>>, vector<8x1xf32>
    %cst_9 = arith.constant dense<0xFF800000> : vector<8xf32>
    %15 = vector.multi_reduction <maximumf>, %4, %cst_9 [1] : vector<8x32xf32> to vector<8xf32>
    %16 = vector.shape_cast %15 : vector<8xf32> to vector<8x1xf32>
    %17 = arith.maximumf %14, %16 : vector<8x1xf32>
    %18 = vector.broadcast %17 : vector<8x1xf32> to vector<8x32xf32>
    %19 = arith.subf %4, %18 : vector<8x32xf32>
    %20 = math.exp %19 : vector<8x32xf32>
    %cst_10 = arith.constant dense<0.000000e+00> : vector<8xf32>
    %21 = vector.multi_reduction <add>, %20, %cst_10 [1] : vector<8x32xf32> to vector<8xf32>
    %22 = vector.shape_cast %21 : vector<8xf32> to vector<8x1xf32>
    %23 = arith.mulf %20, %3 : vector<8x32xf32>
    %cst_11 = arith.constant dense<0.000000e+00> : vector<8xf32>
    %24 = vector.multi_reduction <add>, %23, %cst_11 [1] : vector<8x32xf32> to vector<8xf32>
    %25 = vector.shape_cast %24 : vector<8xf32> to vector<8x1xf32>
    %26 = arith.subf %5, %8 : vector<8x1xf32>
    %27 = math.exp %26 : vector<8x1xf32>
    %28 = arith.subf %14, %17 : vector<8x1xf32>
    %29 = math.exp %28 : vector<8x1xf32>
    %c0_12 = arith.constant 0 : index
    %c0_13 = arith.constant 0 : index
    %30 = vector.load %arg6[%c0_12, %c0_13] : memref<8x1xf32, #tpu.memory_space<vmem>>, vector<8x1xf32>
    %31 = arith.mulf %27, %30 : vector<8x1xf32>
    %32 = arith.addf %31, %13 : vector<8x1xf32>
    %c0_14 = arith.constant 0 : index
    %c0_15 = arith.constant 0 : index
    %33 = vector.load %arg6[%c0_14, %c0_15] : memref<8x1xf32, #tpu.memory_space<vmem>>, vector<8x1xf32>
    tpu.vector_store %arg6[%c0_14, %c0_15], %32 {strides = array<i32>} : memref<8x1xf32, #tpu.memory_space<vmem>>, vector<8x1xf32>,
    %c0_16 = arith.constant 0 : index
    %c0_17 = arith.constant 0 : index
    %34 = vector.load %arg8[%c0_16, %c0_17] : memref<8x1xf32, #tpu.memory_space<vmem>>, vector<8x1xf32>
    %35 = arith.mulf %29, %34 : vector<8x1xf32>
    %36 = arith.addf %35, %22 : vector<8x1xf32>
    %c0_18 = arith.constant 0 : index
    %c0_19 = arith.constant 0 : index
    %37 = vector.load %arg8[%c0_18, %c0_19] : memref<8x1xf32, #tpu.memory_space<vmem>>, vector<8x1xf32>
    tpu.vector_store %arg8[%c0_18, %c0_19], %36 {strides = array<i32>} : memref<8x1xf32, #tpu.memory_space<vmem>>, vector<8x1xf32>,
    %c0_20 = arith.constant 0 : index
    %c0_21 = arith.constant 0 : index
    %38 = vector.load %arg9[%c0_20, %c0_21] : memref<8x1xf32, #tpu.memory_space<vmem>>, vector<8x1xf32>
    %39 = arith.mulf %29, %38 : vector<8x1xf32>
    %40 = arith.addf %39, %25 : vector<8x1xf32>
    %c0_22 = arith.constant 0 : index
    %c0_23 = arith.constant 0 : index
    %41 = vector.load %arg9[%c0_22, %c0_23] : memref<8x1xf32, #tpu.memory_space<vmem>>, vector<8x1xf32>
    tpu.vector_store %arg9[%c0_22, %c0_23], %40 {strides = array<i32>} : memref<8x1xf32, #tpu.memory_space<vmem>>, vector<8x1xf32>,
    %c0_24 = arith.constant 0 : index
    %c0_25 = arith.constant 0 : index
    %42 = vector.load %arg5[%c0_24, %c0_25] : memref<8x1xf32, #tpu.memory_space<vmem>>, vector<8x1xf32>
    tpu.vector_store %arg5[%c0_24, %c0_25], %8 {strides = array<i32>} : memref<8x1xf32, #tpu.memory_space<vmem>>, vector<8x1xf32>,
    %c0_26 = arith.constant 0 : index
    %c0_27 = arith.constant 0 : index
    %43 = vector.load %arg7[%c0_26, %c0_27] : memref<8x1xf32, #tpu.memory_space<vmem>>, vector<8x1xf32>
    tpu.vector_store %arg7[%c0_26, %c0_27], %17 {strides = array<i32>} : memref<8x1xf32, #tpu.memory_space<vmem>>, vector<8x1xf32>,
    %c0_i32_28 = arith.constant 0 : i32
    %44 = arith.cmpi eq, %arg1, %c0_i32_28 : i32
    %45 = arith.extui %44 : i1 to i32
    %c0_i32_29 = arith.constant 0 : i32
    %46 = arith.cmpi ne, %45, %c0_i32_29 : i32
    scf.if %46 {
      %c0_30 = arith.constant 0 : index
      %c0_31 = arith.constant 0 : index
      %47 = vector.load %arg5[%c0_30, %c0_31] : memref<8x1xf32, #tpu.memory_space<vmem>>, vector<8x1xf32>
      %c0_32 = arith.constant 0 : index
      %c0_33 = arith.constant 0 : index
      %48 = vector.load %arg6[%c0_32, %c0_33] : memref<8x1xf32, #tpu.memory_space<vmem>>, vector<8x1xf32>
      %49 = math.log %48 : vector<8x1xf32>
      %50 = arith.addf %47, %49 : vector<8x1xf32>
      %c0_34 = arith.constant 0 : index
      %c0_35 = arith.constant 0 : index
      %51 = vector.load %arg9[%c0_34, %c0_35] : memref<8x1xf32, #tpu.memory_space<vmem>>, vector<8x1xf32>
      %c0_36 = arith.constant 0 : index
      %c0_37 = arith.constant 0 : index
      %52 = vector.load %arg8[%c0_36, %c0_37] : memref<8x1xf32, #tpu.memory_space<vmem>>, vector<8x1xf32>
      %53 = arith.divf %51, %52 : vector<8x1xf32>
      %54 = arith.subf %50, %53 : vector<8x1xf32>
      %55 = vector.shape_cast %54 : vector<8x1xf32> to vector<1x8x1xf32>
      %cst_38 = arith.constant dense<0.000000e+00> : vector<1xf32>
      %56 = vector.multi_reduction <add>, %55, %cst_38 [1, 2] : vector<1x8x1xf32> to vector<1xf32>
      %57 = vector.shape_cast %56 : vector<1xf32> to vector<1x1x1xf32>
      %58 = vector.extract %57[0, 0, 0] : f32 from vector<1x1x1xf32>
      %59 = vector.broadcast %58 : f32 to vector<1x8x128xf32>
      %c0_39 = arith.constant 0 : index
      %c0_40 = arith.constant 0 : index
      %c0_41 = arith.constant 0 : index
      %60 = vector.load %arg4[%c0_39, %c0_40, %c0_41] : memref<1x8x128xf32, #tpu.memory_space<vmem>>, vector<1x8x128xf32>
      tpu.vector_store %arg4[%c0_39, %c0_40, %c0_41], %59 {strides = array<i32>} : memref<1x8x128xf32, #tpu.memory_space<vmem>>, vector<1x8x128xf32>,
    } else {
    }
    return
  }
  func.func @transform_0(%arg0: i32, %arg1: i32) -> (i32, i32) {
    %c0_i32 = arith.constant 0 : i32
    return %arg0, %arg1 : i32, i32
  }
  func.func @transform_1(%arg0: i32, %arg1: i32) -> (i32, i32) {
    %c0_i32 = arith.constant 0 : i32
    return %arg0, %arg1 : i32, i32
  }
  func.func @transform_2(%arg0: i32, %arg1: i32) -> (i32, i32, i32) {
    %c0_i32 = arith.constant 0 : i32
    %c0_i32_0 = arith.constant 0 : i32
    %c0_i32_1 = arith.constant 0 : i32
    return %arg0, %c0_i32, %c0_i32_0 : i32, i32, i32
  }
}

</mosaic_0001>

<bundles_post_ra>
// kernel: tpu_custom_call.1
= control target key start
LH: loop header
LB: loop body
LE: loop exit
PB: predicated region body
PF: predicated region fallthrough
CT: control target
= control target key end

     0   :  { %7 = vsyncpa [#allocation8], 0  ;;  %s938_s0 = inlined_call_operand.hbm [shape: f32[16,32], index: 0, kind: input, shape index: {}]   ;;  %s939_s1 = inlined_call_operand.hbm [shape: f32[16,32], index: 1, kind: input, shape index: {}]   ;;  %s940_s2 = inlined_call_operand.hbm [shape: f32[2,8,128], index: 2, kind: output, shape index: {}]  }
   0x1   :  { %9 = vsyncpa [#allocation8 + $0x1], 0 }
   0x2   :  { %10 = vsyncpa [#allocation11], 0 }
   0x3   :  { %12 = vsyncpa [#allocation11 + $0x1], 0 }
   0x4   :  { %13 = vsyncpa [#allocation9], 0 }
   0x5   :  { %15 = vsyncpa [#allocation9 + $0x1], 0  ;;  %s697_s9 = smov 0   ;;  %s699_s10 = smov 0  }
   0x6   :  { %s701_s11 = smov 0   ;;  %s703_s12 = smov 0  }
   0x7   :  { %s705_s13 = smov 0   ;;  %s707_s14 = smov 0  }
   0x8 LB: > { %s426_s15 = sadd.s32 4294967295, %s674_s14   ;;  %s427_s16 = sadd.s32 4294967294, %s674_s14   ;;  %s674_s14 = sphi %s707_s14, %s21_s14   ;;  %s670_s13 = sphi %s705_s13, %s960_s13   ;;  %s666_s12 = sphi %s703_s12, %s959_s12   ;;  %s662_s11 = sphi %s701_s11, %s958_s11   ;;  %s658_s10 = sphi %s699_s10, %s957_s10   ;;  %s654_s9 = sphi %s697_s9, %s956_s9  }
   0x9   : > { %s33_s17 = sadd.s32 1, %s670_s13  ;;  %s42_s18 = sadd.s32 1, %s662_s11 }
   0xa   : > { %p35_p0 = scmp.ge.s32.totalorder %s33_s17, 2  ;;  %p49_p1 = scmp.ne.s32.totalorder %s662_s11, %s658_s10 }
   0xb   : > { %p50_p2 = scmp.eq.s32.totalorder %s674_s14, 0  ;;  %p55_p3 = scmp.ne.s32.totalorder %s658_s10, %s654_s9 }
   0xc   : > { %s962_s17 = smov (%p35_p0, %s33_s17), 0  ;;  %p56_p5 = scmp.eq.s32.totalorder %s426_s15, 0 }
   0xd   : > { %p738_p4 = por %p50_p2, %p49_p1  ;;  %s37_s20 = ssub.s32 %s670_s13, %s962_s17 }
   0xe   : > { %p107_p6 = scmp.eq.s32.totalorder %s426_s15, 1  ;;  %p40_p7 = scmp.eq.s32.totalorder %s37_s20, 0 }
   0xf   : > { %p744_p8 = por %p56_p5, %p55_p3  ;;  %p113_p10 = scmp.eq.s32.totalorder %s427_s16, 1 }
  0x10   : > { %p748_p9 = por %p107_p6, %p49_p1  ;;  %p461_p13 = scmp.lt.s32.totalorder %s674_s14, 2 }
  0x11   : > { %s944_s21 = scalar_select %p744_p8, 1, 0 }
  0x12   : > { %s945_s22 = scalar_select %p748_p9, 1, 0 }
  0x13   : > { %s753_s23 = scalar_select %p40_p7, %s662_s11, %s42_s18  }
  0x14   : > { %p755_p11 = por %p113_p10, %p55_p3  ;;  %s762_s25 = sand.u32 1, %s662_s11  }
  0x15   : > { %s430_s26 = sshll.u32 %s762_s25, 3  ;;  %s431_s27 = sshll.u32 %s670_s13, 7 }
  0x16   : > { %s946_s24 = scalar_select %p755_p11, 1, 0 }
  0x17   : > { %s771_s30 = scalar_lea.hbm %s938_s0, %s431_s27  ;;  %s137_s3 = scalar_lea.vmem [#allocation7], %s430_s26 }
  0x18   : > { %s145_s4 = sshll.u32 %s137_s3, 4  ;;  %p779_p0 = pnand %p461_p13, %p738_p4  ;;  %s775_s4 = int_to_ptr.vmem [resolvable:$true] %s145_s4 }
  0x19   : > { %s134_s6 = scalar_lea.sflag [#allocation8], %s762_s25  ;;  %s528_s7 = scalar_lea.hbm %s771_s30, 128 }
  0x1a   : > { %p529_p3 = scmp.ne.s32.totalorder %s771_s30, %s528_s7  ;;  %p530_p5 = pneg %p779_p0 }
  0x1b   : > { %s533_s16 = scalar_lea.hbm %s938_s0, 256  ;;  %p534_p4 = scmp.lt.u32.totalorder %s771_s30, %s938_s0 }
  0x1c   : > { %p531_p6 = pnand %p530_p5, %p529_p3  ;;  %p535_p10 = scmp.lt.u32.totalorder %s533_s16, %s528_s7 }
  0x1d   : > { %p537_p12 = scmp.lt.u32.totalorder %s528_s7, %s771_s30 }
  0x1e   : > { %p532_p7 = pneg %p531_p6  ;;  %p536_p13 = por %p535_p10, %p534_p4 }
  0x20   : > { %p538_p1 = por %p537_p12, %p536_p13 }
  0x22   : > { %p539_p2 = pnand %p538_p1, %p532_p7 }
  0x24   : > { %542 = shalt.err (!%p539_p2)
}
  0x25   : > { %s543_s20 = scalar_lea.vmem %s775_s4, 128  ;;  %s676_s28 = smov [#allocation7]  }
  0x26   : > { %p544_p3 = scmp.ne.s32.totalorder %s775_s4, %s543_s20  ;;  %s548_s29 = sshll.u32 %s676_s28, 4  ;;  %s549_s29 = int_to_ptr.vmem [resolvable:$false] %s548_s29 }
  0x27   : > { %s550_s3 = scalar_lea.vmem %s549_s29, 256  ;;  %p551_p9 = scmp.lt.s32.totalorder %s775_s4, %s549_s29 }
  0x28   : > { %p546_p6 = pnand %p544_p3, %p530_p5  ;;  %p552_p4 = scmp.lt.s32.totalorder %s550_s3, %s543_s20 }
  0x2a   : > { %p547_p11 = pneg %p546_p6  ;;  %p553_p10 = por %p552_p4, %p551_p9 }
  0x2c   : > { %p554_p12 = pnand %p553_p10, %p547_p11 }
  0x2e   : > { %557 = shalt.err (!%p554_p12)
}
  0x2f   : > { %453 = dma.hbm_to_vmem [thread:$0]  (!%p779_p0), %s771_s30, 128, %s775_s4, %s134_s6  }
  0x30   : > { %p948_p1 = scmp.lt.s32.totalorder %s674_s14, 3  ;;  %p949_p2 = scmp.ge.s32.totalorder %s674_s14, 1 }
  0x31   : > { %s824_s16 = scalar_lea.hbm %s939_s1, %s431_s27  ;;  %s156_s18 = scalar_lea.vmem [#allocation10], %s430_s26 }
  0x32   : > { %p815_p7 = pnand %p949_p2, %p948_p1  ;;  %s164_s19 = sshll.u32 %s156_s18, 4  ;;  %s165_s19 = int_to_ptr.vmem [resolvable:$true] %s164_s19 }
  0x33   : > { %s153_s30 = scalar_lea.sflag [#allocation11], %s762_s25  ;;  %s558_s4 = scalar_lea.hbm %s824_s16, 128 }
  0x34   : > { %s950_s7 = scalar_select %p815_p7, 1, 0 }
  0x35   : > { %p559_p9 = scmp.ne.s32.totalorder %s824_s16, %s558_s4  ;;  %s563_s27 = scalar_lea.hbm %s939_s1, 256 }
  0x36   : > { %p564_p3 = scmp.lt.u32.totalorder %s824_s16, %s939_s1  ;;  %p565_p6 = scmp.lt.u32.totalorder %s563_s27, %s558_s4 }
  0x37   : > { %p561_p11 = pnand %p559_p9, %p530_p5  ;;  %p567_p10 = scmp.lt.u32.totalorder %s558_s4, %s824_s16 }
  0x38   : > { %p566_p4 = por %p565_p6, %p564_p3 }
  0x39   : > { %p562_p13 = pneg %p561_p11 }
  0x3a   : > { %p568_p12 = por %p567_p10, %p566_p4 }
  0x3c   : > { %p569_p1 = pnand %p568_p12, %p562_p13 }
  0x3e   : > { %572 = shalt.err (!%p569_p1)
}
  0x3f   : > { %s573_s25 = scalar_lea.vmem %s165_s19, 128  ;;  %s677_s26 = smov [#allocation10]  }
  0x40   : > { %p574_p2 = scmp.ne.s32.totalorder %s165_s19, %s573_s25  ;;  %s578_s3 = sshll.u32 %s677_s26, 4  ;;  %s579_s3 = int_to_ptr.vmem [resolvable:$false] %s578_s3 }
  0x41   : > { %s580_s8 = scalar_lea.vmem %s579_s3, 256  ;;  %p581_p8 = scmp.lt.s32.totalorder %s165_s19, %s579_s3 }
  0x42   : > { %p576_p9 = pnand %p574_p2, %p530_p5  ;;  %p582_p7 = scmp.lt.s32.totalorder %s580_s8, %s573_s25 }
  0x44   : > { %p577_p11 = pneg %p576_p9  ;;  %p583_p3 = por %p582_p7, %p581_p8 }
  0x46   : > { %p584_p6 = pnand %p583_p3, %p577_p11 }
  0x48   : > { %587 = shalt.err (!%p584_p6)
}
  0x49   : > { %456 = dma.hbm_to_vmem [thread:$0]  (!%p779_p0), %s824_s16, 128, %s165_s19, %s153_s30  }
  0x4a   : > { %p951_p13 = scmp.ne.s32.totalorder %s950_s7, 0 }
  0x4b   : > { %s851_s15 = sand.u32 (!%p951_p13), 1, %s658_s10   ;;  %p952_p8 = scmp.ne.s32.totalorder (!%p951_p13), %s944_s21, 0 }
  0x4c   : > { %173 = sbr.rel (%p951_p13) target bundleno = 767 (0x2ff), region = 28  ;;  %s854_s18 = sshll.u32 (!%p951_p13), %s851_s15, 3 }
  0x4d   : > { %s176_s4 = scalar_lea.sflag (!%p951_p13), [#allocation8], %s851_s15  ;;  %s179_s6 = scalar_lea.vmem (!%p951_p13), [#allocation7], %s854_s18 }
  0x53   : > { %641 = dma.done.wait (%p952_p8), %s176_s4, 128  }
  0x54   : > { %643 = vsyncadd (%p952_p8), %s176_s4, 4294967168  ;;  %s185_s5 = scalar_lea.sflag [#allocation11], %s851_s15  ;;  %s188_s7 = scalar_lea.vmem [#allocation10], %s854_s18 }
  0x55   : > { %645 = dma.done.wait (%p952_p8), %s185_s5, 128  }
  0x56   : > { %647 = vsyncadd (%p952_p8), %s185_s5, 4294967168  ;;  %vm218_vm0 = vcmask 7168   ;;  %v678_v0 = vmov -inf   ;;  %vm227_vm1 = vcmask 261120   ;;  %v224_v1 = vld [vmem:[%s179_s6] sm:$0xff]  ;;  %v225_v2 = vld [vmem:[%s188_s7] sm:$0xff] }
  0x57   : > { %219 = vst.msk [vmem:[#allocation2] sm:$0xff] %vm218_vm0, %v678_v0  ;;  %220 = vst.msk [vmem:[#allocation4] sm:$0xff] %vm218_vm0, %v678_v0  ;;  %v228_v3 = vsel %vm227_vm1, %v224_v1, -inf  ;;  %v244_v4 = vsel %vm227_vm1, %v225_v2, -inf  ;;  %v679_v5 = vmov 0   ;;  %v680_v6 = vmov 0.0  }
  0x58   : > { %229 = vmax.xlane.f32.xlu0 %v228_v3  ;;  %514 = vset.pattern.permute.xlu1 %v679_v5  ;;  %221 = vst.msk [vmem:[#allocation3] sm:$0xff] %vm218_vm0, %v680_v6  ;;  %222 = vst.msk [vmem:[#allocation5] sm:$0xff] %vm218_vm0, %v680_v6  ;;  %s213_s21 = scalar_lea.vmem [#allocation12], %s854_s18  ;;  %s439_s19 = sshll.u32 %s666_s12, 7 }
  0x59   : > { %515 = vset.pattern.permute.xlu0 %v679_v5  ;;  %223 = vst.msk [vmem:[#allocation6] sm:$0xff] %vm218_vm0, %v680_v6  ;;  %s323_s16 = sshll.u32 %s213_s21, 4  ;;  %s891_s28 = scalar_lea.hbm %s940_s2, %s439_s19  ;;  %s886_s16 = int_to_ptr.vmem [resolvable:$true] %s323_s16 }
  0x5a   : > { %s310_s29 = scalar_lea.sflag [#allocation9], %s851_s15  ;;  %s588_s25 = scalar_lea.vmem %s886_s16, 128 }
  0x5b   : > { %p589_p0 = scmp.ne.s32.totalorder %s886_s16, %s588_s25  ;;  %p953_p5 = scmp.ne.s32.totalorder %s945_s22, 0 }
  0x5c   : > { %245 = vmax.xlane.f32.xlu0 %v244_v4  ;;  %s681_s12 = smov [#allocation12]  }
  0x5d   : > { %p590_p7 = pnand %p589_p0, %p953_p5  ;;  %s592_s26 = sshll.u32 %s681_s12, 4  ;;  %s593_s26 = int_to_ptr.vmem [resolvable:$false] %s592_s26 }
  0x5e   : > { %v226_v7 = vld [vmem:[#allocation2] sm:$0xff]  ;;  %v243_v10 = vld [vmem:[#allocation4] sm:$0xff]  ;;  %s594_s3 = scalar_lea.vmem %s593_s26, 256  ;;  %p595_p10 = scmp.lt.s32.totalorder %s886_s16, %s593_s26 }
  0x5f   : > { %v269_v30 = vld [vmem:[#allocation3] sm:$0xff]  ;;  %v274_v34 = vld [vmem:[#allocation5] sm:$0xff]  ;;  %p591_p4 = pneg %p590_p7  ;;  %p596_p12 = scmp.lt.s32.totalorder %s594_s3, %s588_s25 }
  0x60   : > { %v278_v36 = vld [vmem:[#allocation6] sm:$0xff] }
  0x61   : > { %p597_p1 = por %p596_p12, %p595_p10 }
  0x63   : > { %p598_p2 = pnand %p597_p1, %p591_p4 }
  0xe5   : > { %v230_v8 = vpop.xlane.xlu0 %229 }
  0xe6   : > { %v231_v9 = vmax.f32 %v226_v7, %v230_v8 }
  0xe8   : > { %v263_v11 = vsub.f32 %v226_v7, %v231_v9  ;;  %282 = vst.msk [vmem:[#allocation2] sm:$0xff] %vm218_vm0, %v231_v9  ;;  %234 = vperm.xlu1 %514, %v231_v9  }
  0xe9   : > { %v246_v12 = vpop.xlane.xlu0 %245 }
  0xea   : > { %v247_v13 = vmax.f32 %v243_v10, %v246_v12  ;;  %v264_v27 = vmul.f32 1.442695, %v263_v11 }
  0xec   : > { %v266_v14 = vsub.f32 %v243_v10, %v247_v13  ;;  %283 = vst.msk [vmem:[#allocation4] sm:$0xff] %vm218_vm0, %v247_v13  ;;  %250 = vperm.xlu1 %514, %v247_v13  }
  0xee   : > { %v267_v28 = vmul.f32 1.442695, %v266_v14 }
  0xef   : > { %v287_v48 = vld [vmem:[#allocation2] sm:$0xff] }
 0x167   : > { %v235_v15 = vpop.permute.xlu1 %234 }
 0x168   : > { %v237_v16 = vsub.f32 %v224_v1, %v235_v15 }
 0x16a   : > { %v238_v17 = vmul.f32 1.442695, %v237_v16 }
 0x16b   : > { %v251_v18 = vpop.permute.xlu1 %250 }
 0x16c   : > { %516 = vpow2.f32 %v238_v17  ;;  %v253_v19 = vsub.f32 %v225_v2, %v251_v18 }
 0x16e   : > { %v254_v20 = vmul.f32 1.442695, %v253_v19 }
 0x170   : > { %518 = vpow2.f32 %v254_v20 }
 0x171   : > { %520 = vpow2.f32 %v264_v27 }
 0x172   : > { %522 = vpow2.f32 %v267_v28 }
 0x176   : > { %v517_v21 = vpop.eup %516 }
 0x177   : > { %v240_v22 = vsel %vm227_vm1, %v517_v21, 0.0 }
 0x178   : > { %241 = vadd.xlane.f32.xlu0 %v240_v22 }
 0x17a   : > { %v519_v23 = vpop.eup %518 }
 0x17b   : > { %v256_v24 = vsel %vm227_vm1, %v519_v23, 0.0  ;;  %v259_v25 = vmul.f32 %v519_v23, %v224_v1  ;;  %v521_v29 = vpop.eup %520 }
 0x17c   : > { %257 = vadd.xlane.f32.xlu1 %v256_v24  ;;  %v270_v31 = vmul.f32 %v521_v29, %v269_v30  ;;  %v523_v32 = vpop.eup %522 }
 0x17d   : > { %v260_v26 = vsel %vm227_vm1, %v259_v25, 0.0  ;;  %v275_v37 = vmul.f32 %v523_v32, %v274_v34  ;;  %v279_v40 = vmul.f32 %v523_v32, %v278_v36 }
 0x17e   : > { %261 = vadd.xlane.f32.xlu0 %v260_v26 }
 0x205   : > { %v242_v33 = vpop.xlane.xlu0 %241 }
 0x206   : > { %v271_v35 = vadd.f32 %v270_v31, %v242_v33 }
 0x208   : > { %273 = vst.msk [vmem:[#allocation3] sm:$0xff] %vm218_vm0, %v271_v35 }
 0x209   : > { %v258_v38 = vpop.xlane.xlu1 %257 }
 0x20a   : > { %v276_v39 = vadd.f32 %v275_v37, %v258_v38 }
 0x20b   : > { %v262_v41 = vpop.xlane.xlu0 %261 }
 0x20c   : > { %277 = vst.msk [vmem:[#allocation5] sm:$0xff] %vm218_vm0, %v276_v39  ;;  %v280_v42 = vadd.f32 %v279_v40, %v262_v41 }
 0x20e   : > { %281 = vst.msk [vmem:[#allocation6] sm:$0xff] %vm218_vm0, %v280_v42 }
 0x20f   : > { %v288_v43 = vld [vmem:[#allocation3] sm:$0xff] }
 0x210   : > { %524 = vlog2.f32 %v288_v43 }
 0x213   : > { %v293_v44 = vld [vmem:[#allocation5] sm:$0xff] }
 0x214   : > { %526 = vrcp.f32 %v293_v44 }
 0x215   : > { %v292_v49 = vld [vmem:[#allocation6] sm:$0xff] }
 0x21a   : > { %v525_v45 = vpop.eup %524 }
 0x21b   : > { %v290_v46 = vmul.f32 0.6931472, %v525_v45 }
 0x21d   : > { %v291_v50 = vadd.f32 %v290_v46, %v287_v48 }
 0x21e   : > { %v527_v47 = vpop.eup %526 }
 0x21f   : > { %v295_v51 = vmul.f32 %v527_v47, %v292_v49 }
 0x221   : > { %v296_v52 = vsub.f32 %v291_v50, %v295_v51 }
 0x223   : > { %v297_v53 = vsel %vm218_vm0, %v296_v52, 0.0 }
 0x224   : > { %298 = vadd.xlane.f32.xlu0 %v297_v53 }
 0x2b1   : > { %v299_v54 = vpop.xlane.xlu0 %298 }
 0x2b2   : > { %v300_v55 = vrot.slane %v299_v54, 4 }
 0x2b4   : > { %v301_v56 = vadd.f32 %v300_v55, %v299_v54 }
 0x2b6   : > { %v302_v57 = vrot.slane %v301_v56, 2 }
 0x2b8   : > { %v303_v58 = vadd.f32 %v302_v57, %v301_v56 }
 0x2ba   : > { %v304_v59 = vrot.slane %v303_v58, 1 }
 0x2bc   : > { %v305_v60 = vadd.f32 %v304_v59, %v303_v58 }
 0x2be   : > { %442 = vpush %v305_v60 }
 0x2ef   : > { %s443_s30 = spop %442 }
 0x2f0   : > { %v307_v61 = vstv %s443_s30 }
 0x2f1   : > { %308 = vst [vmem:[%s213_s21] sm:$0xff] %v307_v61 }
 0x2f2   : > { %601 = shalt.err (!%p598_p2)
}
 0x2f3   : > { %s602_s8 = scalar_lea.hbm %s891_s28, 128  ;;  %s606_s4 = scalar_lea.hbm %s940_s2, 256 }
 0x2f4   : > { %p603_p9 = scmp.ne.s32.totalorder %s891_s28, %s602_s8  ;;  %p607_p6 = scmp.lt.u32.totalorder %s891_s28, %s940_s2 }
 0x2f5   : > { %p608_p13 = scmp.lt.u32.totalorder %s606_s4, %s602_s8  ;;  %p610_p0 = scmp.lt.u32.totalorder %s602_s8, %s891_s28 }
 0x2f6   : > { %p604_p11 = pnand %p603_p9, %p953_p5 }
 0x2f7   : > { %p609_p8 = por %p608_p13, %p607_p6 }
 0x2f8   : > { %p605_p3 = pneg %p604_p11 }
 0x2f9   : > { %p611_p7 = por %p610_p0, %p609_p8 }
 0x2fb   : > { %p612_p4 = pnand %p611_p7, %p605_p3 }
 0x2fd   : > { %615 = shalt.err (!%p612_p4)
}
 0x2fe   : > { %448 = dma.vmem_to_hbm [thread:$0]  (%p953_p5), %s886_s16, 128, %s891_s28, %s310_s29  }
 0x2ff PF: > { %s335_s7 = sand.u32 1, %s654_s9   ;;  %p954_p10 = scmp.ne.s32.totalorder %s946_s24, 0 }
 0x300   : > { %p955_p12 = scmp.ge.s32.totalorder %s674_s14, 2  ;;  %s336_s21 = scalar_lea.sflag [#allocation9], %s335_s7 }
 0x302   : > { %p458_p1 = pnand %p955_p12, %p954_p10 }
 0x304   : > { %649 = dma.done.wait (!%p458_p1), %s336_s21, 128  }
 0x305   : > { %651 = vsyncadd (!%p458_p1), %s336_s21, 4294967168  ;;  %s21_s14 = sadd.s32 1, %s674_s14   ;;  %s956_s9 = smov %s658_s10 }
 0x306   : > { %p18_p2 = scmp.ge.s32.totalorder %s21_s14, 4   ;;  %s957_s10 = smov %s662_s11 }
 0x307   : > { %s958_s11 = smov %s753_s23  ;;  %s959_s12 = smov %s670_s13 }
 0x308   : > { %s960_s13 = smov %s962_s17  ;;  %20 = sbr.rel (!%p18_p2) target bundleno = 8 (0x8), region = 94 }
 0x30f   :  { %341 = vsyncpa [#allocation8], 1 }
 0x310   :  { %343 = vsyncpa [#allocation8 + $0x1], 1 }
 0x311   :  { %344 = vsyncpa [#allocation11], 1 }
 0x312   :  { %346 = vsyncpa [#allocation11 + $0x1], 1 }
 0x313   :  { %347 = vsyncpa [#allocation9], 1 }
 0x314   :  { %349 = vsyncpa [#allocation9 + $0x1], 1 }

</bundles_post_ra>
